<compile_context>
chip_gen: v7x
topology: tpu7x:2x2x1
jax: 0.10.0
libtpu: 0.0.40
codegen_flags: <defaults>
</compile_context>

<pallas_src>
import jax
import jax.numpy as jnp
from jax.experimental import pallas as pl
from jax.experimental.pallas import tpu as pltpu


def _round_up(x, m):
    return ((x + m - 1) // m) * m


def patient2vec_kernel(sym_ref, trt_ref, hid_ref,
                       wsym_ref, wtrt_ref, whid_ref, bst_ref,
                       wh_ref, wo_ref, bo_ref,
                       out_ref):
    # Fused first layer: a_st = [a_s_pad | a_t_pad]  (lane-concatenated, each
    # padded to Np lanes).  Split-K over (symptom, treatment, hidden) refs —
    # no concat, hidden loaded once, Ws/Wt fused along N.
    a_st = (jnp.dot(sym_ref[...], wsym_ref[...],
                    preferred_element_type=jnp.float32)
            + jnp.dot(trt_ref[...], wtrt_ref[...],
                      preferred_element_type=jnp.float32)
            + jnp.dot(hid_ref[...], whid_ref[...],
                      preferred_element_type=jnp.float32)
            + bst_ref[...])

    half = wsym_ref.shape[1] // 2          # Np (multiple of 128)
    a_s = a_st[:, :half]                   # 128-aligned lane slice
    a_t = a_st[:, half:]

    # Hadamard product; padded lanes are 0*0 = 0, so they contribute nothing.
    hadam = a_s * a_t

    # ho = tanh(h2o(hadam))   (no bias); padded rows of wh are zero.
    ho = jnp.tanh(jnp.dot(hadam, wh_ref[...],
                          preferred_element_type=jnp.float32))

    # oo = o2o(ho); output stored lane-dense at Hp (=128) lanes.
    oo = jnp.dot(ho, wo_ref[...],
                 preferred_element_type=jnp.float32) + bo_ref[...]
    out_ref[...] = oo.astype(out_ref.dtype)


def patient2vec_forward(symptom, treatment, hidden, params):
    """Forward pass.  Wrapper only pads/packs weights (done once per call) and
    sets up a batch-tiled, weight-resident Pallas grid."""
    B, S = symptom.shape
    T = treatment.shape[1]
    H = hidden.shape[1]
    H3, H2 = 3 * H, 2 * H

    # Padded lane widths (multiples of 128 → lane-dense stores, aligned slices).
    Np = _round_up(H3, 128)     # per-slab width for a_s / a_t
    Mp = _round_up(H2, 128)     # width of ho
    Hp = _round_up(H, 128)      # output width

    f32 = jnp.float32
    ws, bs = params["w_s2h"], params["b_s2h"]      # [3H, S+H], [3H]
    wt, bt = params["w_t2h"], params["b_t2h"]      # [3H, T+H], [3H]
    wh = params["w_h2o"]                           # [2H, 3H]
    wo, bo = params["w_o2o"], params["b_o2o"]      # [H, 2H], [H]

    # Split-K / N-fused, zero-padded weight layout:
    #   columns [0:3H]        -> a_s (s2h part)
    #   columns [Np:Np+3H]    -> a_t (t2h part)
    w_sym = jnp.zeros((S, 2 * Np), f32).at[:, :H3].set(ws[:, :S].T)
    w_trt = jnp.zeros((T, 2 * Np), f32).at[:, Np:Np + H3].set(wt[:, :T].T)
    w_hid = (jnp.zeros((H, 2 * Np), f32)
             .at[:, :H3].set(ws[:, S:].T)
             .at[:, Np:Np + H3].set(wt[:, T:].T))
    b_st = (jnp.zeros((1, 2 * Np), f32)
            .at[0, :H3].set(bs)
            .at[0, Np:Np + H3].set(bt))
    wh_p = jnp.zeros((Np, Mp), f32).at[:H3, :H2].set(wh.T)
    wo_p = jnp.zeros((Mp, Hp), f32).at[:H2, :H].set(wo.T)
    bo_p = jnp.zeros((1, Hp), f32).at[0, :H].set(bo)

    # Batch tiling: fill the MXU row dimension when B is large; weights stay
    # VMEM-resident across tiles via constant index_maps.
    Bt = 128 if B >= 128 else _round_up(B, 8)
    B_pad = _round_up(B, Bt)
    if B_pad != B:
        pad_rows = lambda a: jnp.pad(a, ((0, B_pad - B), (0, 0)))
        symptom, treatment, hidden = (pad_rows(symptom), pad_rows(treatment),
                                      pad_rows(hidden))
    grid = (pl.cdiv(B_pad, Bt),)

    def row_spec(ncols):
        return pl.BlockSpec((Bt, ncols), lambda i: (i, 0))

    def const_spec(shape):
        return pl.BlockSpec(shape, lambda i: (0, 0))

    out = pl.pallas_call(
        patient2vec_kernel,
        out_shape=jax.ShapeDtypeStruct((B_pad, Hp), jnp.float32),
        grid=grid,
        in_specs=[
            row_spec(S), row_spec(T), row_spec(H),
            const_spec((S, 2 * Np)), const_spec((T, 2 * Np)),
            const_spec((H, 2 * Np)), const_spec((1, 2 * Np)),
            const_spec((Np, Mp)), const_spec((Mp, Hp)), const_spec((1, Hp)),
        ],
        out_specs=pl.BlockSpec((Bt, Hp), lambda i: (i, 0)),
        compiler_params=pltpu.CompilerParams(
            dimension_semantics=("parallel",)),
    )(symptom, treatment, hidden,
      w_sym, w_trt, w_hid, b_st, wh_p, wo_p, bo_p)

    return out[:B, :H]


def patient2vec_reference(symptom, treatment, hidden, params):
    cs = jnp.concatenate([symptom, hidden], axis=1)
    ct = jnp.concatenate([treatment, hidden], axis=1)
    a_s = cs @ params["w_s2h"].T + params["b_s2h"]
    a_t = ct @ params["w_t2h"].T + params["b_t2h"]
    ho = jnp.tanh((a_s * a_t) @ params["w_h2o"].T)
    return ho @ params["w_o2o"].T + params["b_o2o"]


def init_params(key, symptom_size, treatment_size, hidden_size):
    """Deterministic synthetic init mirroring nn.Linear shapes."""
    ks = jax.random.split(key, 7)
    H = hidden_size

    def lin_w(k, out_f, in_f):
        bound = 1.0 / jnp.sqrt(in_f)
        return jax.random.uniform(k, (out_f, in_f), jnp.float32, -bound, bound)

    def lin_b(k, out_f, in_f):
        bound = 1.0 / jnp.sqrt(in_f)
        return jax.random.uniform(k, (out_f,), jnp.float32, -bound, bound)

    return {
        "w_s2h": lin_w(ks[0], 3 * H, symptom_size + H),
        "b_s2h": lin_b(ks[1], 3 * H, symptom_size + H),
        "w_t2h": lin_w(ks[2], 3 * H, treatment_size + H),
        "b_t2h": lin_b(ks[3], 3 * H, treatment_size + H),
        "w_h2o": lin_w(ks[4], 2 * H, 3 * H),           # bias=False
        "w_o2o": lin_w(ks[5], H, 2 * H),
        "b_o2o": lin_b(ks[6], H, 2 * H),
    }


if __name__ == "__main__":
    B = 8
    symptom_size = 20
    treatment_size = 12
    hidden_size = 16

    key = jax.random.PRNGKey(0)
    k_sym, k_trt, k_par = jax.random.split(key, 3)

    symptom = jax.random.normal(k_sym, (B, symptom_size), jnp.float32)
    treatment = jax.random.normal(k_trt, (B, treatment_size), jnp.float32)
    hidden = jnp.zeros((B, hidden_size), jnp.float32)  # initHidden(batch_size)

    params = init_params(k_par, symptom_size, treatment_size, hidden_size)

    out = patient2vec_forward(symptom, treatment, hidden, params)
    out = jax.block_until_ready(out)

    ref = patient2vec_reference(symptom, treatment, hidden, params)
    assert out.shape == (B, hidden_size)
    assert jnp.allclose(out, ref, atol=1e-4, rtol=1e-4), "mismatch vs reference"

    print("KERNEL_OK")
</pallas_src>

<mosaic_0001>
module attributes {stable_mosaic.version = 11 : i64} {
  func.func @patient2vec_kernel(%arg0: i32, %arg1: memref<8x20xf32, #tpu.memory_space<vmem>>, %arg2: memref<8x12xf32, #tpu.memory_space<vmem>>, %arg3: memref<8x16xf32, #tpu.memory_space<vmem>>, %arg4: memref<20x256xf32, #tpu.memory_space<vmem>>, %arg5: memref<12x256xf32, #tpu.memory_space<vmem>>, %arg6: memref<16x256xf32, #tpu.memory_space<vmem>>, %arg7: memref<1x256xf32, #tpu.memory_space<vmem>>, %arg8: memref<128x128xf32, #tpu.memory_space<vmem>>, %arg9: memref<128x128xf32, #tpu.memory_space<vmem>>, %arg10: memref<1x128xf32, #tpu.memory_space<vmem>>, %arg11: memref<8x128xf32, #tpu.memory_space<vmem>>) attributes {dimension_semantics = [#tpu.dimension_semantics<parallel>], iteration_bounds = array<i64: 1>, scalar_prefetch = 0 : i64, scratch_operands = 0 : i64, tpu.core_type = #tpu.core_type<tc>, window_params = [{transform_indices = @transform_0, window_bounds = array<i64: 8, 20>}, {transform_indices = @transform_1, window_bounds = array<i64: 8, 12>}, {transform_indices = @transform_2, window_bounds = array<i64: 8, 16>}, {pipeline_mode = #tpu.pipeline_mode<synchronous>, transform_indices = @transform_3, window_bounds = array<i64: 20, 256>}, {pipeline_mode = #tpu.pipeline_mode<synchronous>, transform_indices = @transform_4, window_bounds = array<i64: 12, 256>}, {pipeline_mode = #tpu.pipeline_mode<synchronous>, transform_indices = @transform_5, window_bounds = array<i64: 16, 256>}, {pipeline_mode = #tpu.pipeline_mode<synchronous>, transform_indices = @transform_6, window_bounds = array<i64: 1, 256>}, {pipeline_mode = #tpu.pipeline_mode<synchronous>, transform_indices = @transform_7, window_bounds = array<i64: 128, 128>}, {pipeline_mode = #tpu.pipeline_mode<synchronous>, transform_indices = @transform_8, window_bounds = array<i64: 128, 128>}, {pipeline_mode = #tpu.pipeline_mode<synchronous>, transform_indices = @transform_9, window_bounds = array<i64: 1, 128>}, {transform_indices = @transform_10, window_bounds = array<i64: 8, 128>}]} {
    %c0 = arith.constant 0 : index
    %c0_0 = arith.constant 0 : index
    %0 = vector.load %arg1[%c0, %c0_0] : memref<8x20xf32, #tpu.memory_space<vmem>>, vector<8x20xf32>
    %c0_1 = arith.constant 0 : index
    %c0_2 = arith.constant 0 : index
    %1 = vector.load %arg4[%c0_1, %c0_2] : memref<20x256xf32, #tpu.memory_space<vmem>>, vector<20x256xf32>
    %cst = arith.constant dense<0.000000e+00> : vector<8x256xf32>
    %2 = tpu.matmul %0, %1, %cst {dimension_numbers = #tpu.dot_dimension_numbers<[1], [0], [0], [1], [0, 0, 1, 1], [], []>} : vector<8x20xf32>, vector<20x256xf32>, vector<8x256xf32> -> vector<8x256xf32>
    %c0_3 = arith.constant 0 : index
    %c0_4 = arith.constant 0 : index
    %3 = vector.load %arg2[%c0_3, %c0_4] : memref<8x12xf32, #tpu.memory_space<vmem>>, vector<8x12xf32>
    %c0_5 = arith.constant 0 : index
    %c0_6 = arith.constant 0 : index
    %4 = vector.load %arg5[%c0_5, %c0_6] : memref<12x256xf32, #tpu.memory_space<vmem>>, vector<12x256xf32>
    %cst_7 = arith.constant dense<0.000000e+00> : vector<8x256xf32>
    %5 = tpu.matmul %3, %4, %cst_7 {dimension_numbers = #tpu.dot_dimension_numbers<[1], [0], [0], [1], [0, 0, 1, 1], [], []>} : vector<8x12xf32>, vector<12x256xf32>, vector<8x256xf32> -> vector<8x256xf32>
    %6 = arith.addf %2, %5 : vector<8x256xf32>
    %c0_8 = arith.constant 0 : index
    %c0_9 = arith.constant 0 : index
    %7 = vector.load %arg3[%c0_8, %c0_9] : memref<8x16xf32, #tpu.memory_space<vmem>>, vector<8x16xf32>
    %c0_10 = arith.constant 0 : index
    %c0_11 = arith.constant 0 : index
    %8 = vector.load %arg6[%c0_10, %c0_11] : memref<16x256xf32, #tpu.memory_space<vmem>>, vector<16x256xf32>
    %cst_12 = arith.constant dense<0.000000e+00> : vector<8x256xf32>
    %9 = tpu.matmul %7, %8, %cst_12 {dimension_numbers = #tpu.dot_dimension_numbers<[1], [0], [0], [1], [0, 0, 1, 1], [], []>} : vector<8x16xf32>, vector<16x256xf32>, vector<8x256xf32> -> vector<8x256xf32>
    %10 = arith.addf %6, %9 : vector<8x256xf32>
    %c0_13 = arith.constant 0 : index
    %c0_14 = arith.constant 0 : index
    %11 = vector.load %arg7[%c0_13, %c0_14] : memref<1x256xf32, #tpu.memory_space<vmem>>, vector<1x256xf32>
    %12 = vector.broadcast %11 : vector<1x256xf32> to vector<8x256xf32>
    %13 = arith.addf %10, %12 : vector<8x256xf32>
    %14 = vector.extract_strided_slice %13 {offsets = [0, 0], sizes = [8, 128], strides = [1, 1]} : vector<8x256xf32> to vector<8x128xf32>
    %15 = vector.extract_strided_slice %13 {offsets = [0, 128], sizes = [8, 128], strides = [1, 1]} : vector<8x256xf32> to vector<8x128xf32>
    %16 = arith.mulf %14, %15 : vector<8x128xf32>
    %c0_15 = arith.constant 0 : index
    %c0_16 = arith.constant 0 : index
    %17 = vector.load %arg8[%c0_15, %c0_16] : memref<128x128xf32, #tpu.memory_space<vmem>>, vector<128x128xf32>
    %cst_17 = arith.constant dense<0.000000e+00> : vector<8x128xf32>
    %18 = tpu.matmul %16, %17, %cst_17 {dimension_numbers = #tpu.dot_dimension_numbers<[1], [0], [0], [1], [0, 0, 1, 1], [], []>} : vector<8x128xf32>, vector<128x128xf32>, vector<8x128xf32> -> vector<8x128xf32>
    %19 = math.tanh %18 : vector<8x128xf32>
    %c0_18 = arith.constant 0 : index
    %c0_19 = arith.constant 0 : index
    %20 = vector.load %arg9[%c0_18, %c0_19] : memref<128x128xf32, #tpu.memory_space<vmem>>, vector<128x128xf32>
    %cst_20 = arith.constant dense<0.000000e+00> : vector<8x128xf32>
    %21 = tpu.matmul %19, %20, %cst_20 {dimension_numbers = #tpu.dot_dimension_numbers<[1], [0], [0], [1], [0, 0, 1, 1], [], []>} : vector<8x128xf32>, vector<128x128xf32>, vector<8x128xf32> -> vector<8x128xf32>
    %c0_21 = arith.constant 0 : index
    %c0_22 = arith.constant 0 : index
    %22 = vector.load %arg10[%c0_21, %c0_22] : memref<1x128xf32, #tpu.memory_space<vmem>>, vector<1x128xf32>
    %23 = vector.broadcast %22 : vector<1x128xf32> to vector<8x128xf32>
    %24 = arith.addf %21, %23 : vector<8x128xf32>
    %c0_23 = arith.constant 0 : index
    %c0_24 = arith.constant 0 : index
    %25 = vector.load %arg11[%c0_23, %c0_24] : memref<8x128xf32, #tpu.memory_space<vmem>>, vector<8x128xf32>
    tpu.vector_store %arg11[%c0_23, %c0_24], %24 {strides = array<i32>} : memref<8x128xf32, #tpu.memory_space<vmem>>, vector<8x128xf32>,
    return
  }
  func.func @transform_0(%arg0: i32) -> (i32, i32) {
    %c0_i32 = arith.constant 0 : i32
    %c0_i32_0 = arith.constant 0 : i32
    return %arg0, %c0_i32 : i32, i32
  }
  func.func @transform_1(%arg0: i32) -> (i32, i32) {
    %c0_i32 = arith.constant 0 : i32
    %c0_i32_0 = arith.constant 0 : i32
    return %arg0, %c0_i32 : i32, i32
  }
  func.func @transform_2(%arg0: i32) -> (i32, i32) {
    %c0_i32 = arith.constant 0 : i32
    %c0_i32_0 = arith.constant 0 : i32
    return %arg0, %c0_i32 : i32, i32
  }
  func.func @transform_3(%arg0: i32) -> (i32, i32) {
    %c0_i32 = arith.constant 0 : i32
    %c0_i32_0 = arith.constant 0 : i32
    %c0_i32_1 = arith.constant 0 : i32
    return %c0_i32, %c0_i32_0 : i32, i32
  }
  func.func @transform_4(%arg0: i32) -> (i32, i32) {
    %c0_i32 = arith.constant 0 : i32
    %c0_i32_0 = arith.constant 0 : i32
    %c0_i32_1 = arith.constant 0 : i32
    return %c0_i32, %c0_i32_0 : i32, i32
  }
  func.func @transform_5(%arg0: i32) -> (i32, i32) {
    %c0_i32 = arith.constant 0 : i32
    %c0_i32_0 = arith.constant 0 : i32
    %c0_i32_1 = arith.constant 0 : i32
    return %c0_i32, %c0_i32_0 : i32, i32
  }
  func.func @transform_6(%arg0: i32) -> (i32, i32) {
    %c0_i32 = arith.constant 0 : i32
    %c0_i32_0 = arith.constant 0 : i32
    %c0_i32_1 = arith.constant 0 : i32
    return %c0_i32, %c0_i32_0 : i32, i32
  }
  func.func @transform_7(%arg0: i32) -> (i32, i32) {
    %c0_i32 = arith.constant 0 : i32
    %c0_i32_0 = arith.constant 0 : i32
    %c0_i32_1 = arith.constant 0 : i32
    return %c0_i32, %c0_i32_0 : i32, i32
  }
  func.func @transform_8(%arg0: i32) -> (i32, i32) {
    %c0_i32 = arith.constant 0 : i32
    %c0_i32_0 = arith.constant 0 : i32
    %c0_i32_1 = arith.constant 0 : i32
    return %c0_i32, %c0_i32_0 : i32, i32
  }
  func.func @transform_9(%arg0: i32) -> (i32, i32) {
    %c0_i32 = arith.constant 0 : i32
    %c0_i32_0 = arith.constant 0 : i32
    %c0_i32_1 = arith.constant 0 : i32
    return %c0_i32, %c0_i32_0 : i32, i32
  }
  func.func @transform_10(%arg0: i32) -> (i32, i32) {
    %c0_i32 = arith.constant 0 : i32
    %c0_i32_0 = arith.constant 0 : i32
    return %arg0, %c0_i32 : i32, i32
  }
}

</mosaic_0001>

<bundles_post_ra>
// kernel: tpu_custom_call.1
= control target key start
LH: loop header
LB: loop body
LE: loop exit
PB: predicated region body
PF: predicated region fallthrough
CT: control target
= control target key end

     0   :  { %15 = vsyncpa [#allocation3], 0  ;;  %s1259_s0 = inlined_call_operand.hbm [shape: f32[8,20], index: 0, kind: input, shape index: {}]   ;;  %s1260_s1 = inlined_call_operand.hbm [shape: f32[8,12], index: 1, kind: input, shape index: {}]   ;;  %s1261_s2 = inlined_call_operand.hbm [shape: f32[8,16], index: 2, kind: input, shape index: {}]   ;;  %s1262_s3 = inlined_call_operand.hbm [shape: f32[20,256], index: 3, kind: input, shape index: {}]   ;;  %s1263_s4 = inlined_call_operand.hbm [shape: f32[12,256], index: 4, kind: input, shape index: {}]   ;;  %s1264_s5 = inlined_call_operand.hbm [shape: f32[16,256], index: 5, kind: input, shape index: {}]   ;;  %s1265_s6 = inlined_call_operand.vmem [shape: f32[1,256], index: 6, kind: input, shape index: {}]   ;;  %s1266_s7 = inlined_call_operand.hbm [shape: f32[128,128], index: 7, kind: input, shape index: {}]   ;;  %s1267_s8 = inlined_call_operand.hbm [shape: f32[128,128], index: 8, kind: input, shape index: {}]   ;;  %s1268_s9 = inlined_call_operand.vmem [shape: f32[1,128], index: 9, kind: input, shape index: {}]   ;;  %s1269_s10 = inlined_call_operand.hbm [shape: f32[8,128], index: 10, kind: output, shape index: {}]  }
   0x1   :  { %16 = vsyncpa [#allocation6], 0 }
   0x2   :  { %17 = vsyncpa [#allocation9], 0 }
   0x3   :  { %18 = vsyncpa [#allocation12], 0 }
   0x4   :  { %19 = vsyncpa [#allocation15], 0 }
   0x5   :  { %20 = vsyncpa [#allocation4], 0  ;;  %s1018_s13 = smov [#allocation5]   ;;  %s1019_s15 = smov [#allocation8]  }
   0x6   :  { %s37_s14 = sshll.u32 %s1018_s13, 4  ;;  %s56_s16 = sshll.u32 %s1019_s15, 4  ;;  %s38_s14 = int_to_ptr.vmem [resolvable:$true] %s37_s14  ;;  %s1090_s16 = int_to_ptr.vmem [resolvable:$true] %s56_s16 }
   0x7   :  { %s808_s19 = scalar_lea.hbm %s1260_s1, 128 }
   0x8   :  { %p809_p0 = scmp.ne.s32.totalorder %s1260_s1, %s808_s19  ;;  %p812_p1 = scmp.lt.u32.totalorder %s808_s19, %s1260_s1 }
   0xa   :  { %p814_p2 = pnand %p812_p1, %p809_p0 }
   0xc   :  { %817 = shalt.err (!%p814_p2)
}
   0xd   :  { %s818_s24 = scalar_lea.vmem %s38_s14, 128  ;;  %p823_p4 = scmp.lt.s32.totalorder %s38_s14, %s38_s14 }
   0xe   :  { %p819_p3 = scmp.ne.s32.totalorder %s38_s14, %s818_s24  ;;  %p824_p5 = scmp.lt.s32.totalorder %s818_s24, %s818_s24 }
  0x10   :  { %p825_p6 = por %p824_p5, %p823_p4 }
  0x12   :  { %p826_p7 = pnand %p825_p6, %p819_p3 }
  0x14   :  { %829 = shalt.err (!%p826_p7)
}
  0x15   :  { %40 = dma.hbm_to_vmem [thread:$0]  %s1260_s1, 128, %s38_s14, [#allocation6]  }
  0x16   :  { %s830_s29 = scalar_lea.hbm %s1262_s3, 768 }
  0x17   :  { %p831_p8 = scmp.ne.s32.totalorder %s1262_s3, %s830_s29  ;;  %p834_p9 = scmp.lt.u32.totalorder %s830_s29, %s1262_s3 }
  0x19   :  { %p836_p10 = pnand %p834_p9, %p831_p8 }
  0x1b   :  { %839 = shalt.err (!%p836_p10)
}
  0x1c   :  { %s840_s15 = scalar_lea.vmem %s1090_s16, 768  ;;  %p845_p12 = scmp.lt.s32.totalorder %s1090_s16, %s1090_s16 }
  0x1d   :  { %p841_p11 = scmp.ne.s32.totalorder %s1090_s16, %s840_s15  ;;  %p846_p13 = scmp.lt.s32.totalorder %s840_s15, %s840_s15 }
  0x1f   :  { %p847_p0 = por %p846_p13, %p845_p12 }
  0x21   :  { %p848_p1 = pnand %p847_p0, %p841_p11 }
  0x23   :  { %851 = shalt.err (!%p848_p1)
}
  0x24   :  { %s1020_s1 = smov 256   ;;  %s1021_s14 = smov 16  }
  0x25   :  { %62 = dma.hbm_to_vmem [thread:$0]  %s1262_s3, 768, %s1090_s16, [#allocation9], %s1020_s1, %s1020_s1, %s1021_s14  }
  0x26   :  { %s1022_s19 = smov [#allocation11]   ;;  %s1023_s21 = smov [#allocation2]  }
  0x27   :  { %s80_s20 = sshll.u32 %s1022_s19, 4  ;;  %s27_s22 = sshll.u32 %s1023_s21, 4  ;;  %s81_s20 = int_to_ptr.vmem [resolvable:$true] %s80_s20  ;;  %s28_s22 = int_to_ptr.vmem [resolvable:$true] %s27_s22 }
  0x28   :  { %s852_s25 = scalar_lea.hbm %s1264_s5, 512 }
  0x29   :  { %p853_p2 = scmp.ne.s32.totalorder %s1264_s5, %s852_s25  ;;  %p856_p3 = scmp.lt.u32.totalorder %s852_s25, %s1264_s5 }
  0x2b   :  { %p858_p4 = pnand %p856_p3, %p853_p2 }
  0x2d   :  { %861 = shalt.err (!%p858_p4)
}
  0x2e   :  { %s862_s3 = scalar_lea.vmem %s81_s20, 512  ;;  %p867_p6 = scmp.lt.s32.totalorder %s81_s20, %s81_s20 }
  0x2f   :  { %p863_p5 = scmp.ne.s32.totalorder %s81_s20, %s862_s3  ;;  %p868_p7 = scmp.lt.s32.totalorder %s862_s3, %s862_s3 }
  0x31   :  { %p869_p8 = por %p868_p7, %p867_p6 }
  0x33   :  { %p870_p9 = pnand %p869_p8, %p863_p5 }
  0x35   :  { %873 = shalt.err (!%p870_p9)
}
  0x36   :  { %86 = dma.hbm_to_vmem [thread:$0]  %s1264_s5, 512, %s81_s20, [#allocation12], %s1020_s1, %s1020_s1, %s1021_s14  }
  0x37   :  { %s874_s13 = scalar_lea.hbm %s1259_s0, 128 }
  0x38   :  { %p875_p10 = scmp.ne.s32.totalorder %s1259_s0, %s874_s13  ;;  %p878_p11 = scmp.lt.u32.totalorder %s874_s13, %s1259_s0 }
  0x3a   :  { %p880_p12 = pnand %p878_p11, %p875_p10 }
  0x3c   :  { %883 = shalt.err (!%p880_p12)
}
  0x3d   :  { %s884_s21 = scalar_lea.vmem %s28_s22, 128  ;;  %p889_p0 = scmp.lt.s32.totalorder %s28_s22, %s28_s22 }
  0x3e   :  { %p885_p13 = scmp.ne.s32.totalorder %s28_s22, %s884_s21  ;;  %p890_p1 = scmp.lt.s32.totalorder %s884_s21, %s884_s21 }
  0x40   :  { %p891_p2 = por %p890_p1, %p889_p0 }
  0x42   :  { %p892_p3 = pnand %p891_p2, %p885_p13 }
  0x44   :  { %895 = shalt.err (!%p892_p3)
}
  0x45   :  { %30 = dma.hbm_to_vmem [thread:$0]  %s1259_s0, 128, %s28_s22, [#allocation3]  }
  0x46   :  { %s1024_s23 = smov [#allocation7]   ;;  %s1025_s25 = smov [#allocation10]  }
  0x47   :  { %s47_s24 = sshll.u32 %s1024_s23, 4  ;;  %s68_s26 = sshll.u32 %s1025_s25, 4  ;;  %s48_s24 = int_to_ptr.vmem [resolvable:$true] %s47_s24  ;;  %s1151_s26 = int_to_ptr.vmem [resolvable:$true] %s68_s26 }
  0x48   :  { %s896_s29 = scalar_lea.hbm %s1261_s2, 128 }
  0x49   :  { %p897_p4 = scmp.ne.s32.totalorder %s1261_s2, %s896_s29  ;;  %p900_p5 = scmp.lt.u32.totalorder %s896_s29, %s1261_s2 }
  0x4b   :  { %p902_p6 = pnand %p900_p5, %p897_p4 }
  0x4d   :  { %905 = shalt.err (!%p902_p6)
}
  0x4e   :  { %s906_s0 = scalar_lea.vmem %s48_s24, 128  ;;  %p911_p8 = scmp.lt.s32.totalorder %s48_s24, %s48_s24 }
  0x4f   :  { %p907_p7 = scmp.ne.s32.totalorder %s48_s24, %s906_s0  ;;  %p912_p9 = scmp.lt.s32.totalorder %s906_s0, %s906_s0 }
  0x51   :  { %p913_p10 = por %p912_p9, %p911_p8 }
  0x53   :  { %p914_p11 = pnand %p913_p10, %p907_p7 }
  0x55   :  { %917 = shalt.err (!%p914_p11)
}
  0x56   :  { %50 = dma.hbm_to_vmem [thread:$0]  %s1261_s2, 128, %s48_s24, [#allocation6]  }
  0x57   :  { %s918_s17 = scalar_lea.hbm %s1263_s4, 512 }
  0x58   :  { %p919_p12 = scmp.ne.s32.totalorder %s1263_s4, %s918_s17  ;;  %p922_p13 = scmp.lt.u32.totalorder %s918_s17, %s1263_s4 }
  0x5a   :  { %p924_p0 = pnand %p922_p13, %p919_p12 }
  0x5c   :  { %927 = shalt.err (!%p924_p0)
}
  0x5d   :  { %s928_s20 = scalar_lea.vmem %s1151_s26, 512  ;;  %p933_p2 = scmp.lt.s32.totalorder %s1151_s26, %s1151_s26 }
  0x5e   :  { %p929_p1 = scmp.ne.s32.totalorder %s1151_s26, %s928_s20  ;;  %p934_p3 = scmp.lt.s32.totalorder %s928_s20, %s928_s20 }
  0x60   :  { %p935_p4 = por %p934_p3, %p933_p2 }
  0x62   :  { %p936_p5 = pnand %p935_p4, %p929_p1 }
  0x64   :  { %939 = shalt.err (!%p936_p5)
}
  0x65   :  { %74 = dma.hbm_to_vmem [thread:$0]  %s1263_s4, 512, %s1151_s26, [#allocation9], %s1020_s1, %s1020_s1, %s1021_s14  }
  0x66   :  { %s1026_s24 = smov [#allocation13]   ;;  %s940_s29 = scalar_lea.hbm %s1266_s7, 2048 }
  0x67   :  { %s94_s25 = sshll.u32 %s1026_s24, 4  ;;  %p941_p6 = scmp.ne.s32.totalorder %s1266_s7, %s940_s29  ;;  %s95_s25 = int_to_ptr.vmem [resolvable:$true] %s94_s25 }
  0x68   :  { %p944_p7 = scmp.lt.u32.totalorder %s940_s29, %s1266_s7 }
  0x6a   :  { %p946_p8 = pnand %p944_p7, %p941_p6 }
  0x6c   :  { %949 = shalt.err (!%p946_p8)
}
  0x6d   :  { %s950_s0 = scalar_lea.vmem %s95_s25, 2048  ;;  %p955_p10 = scmp.lt.s32.totalorder %s95_s25, %s95_s25 }
  0x6e   :  { %p951_p9 = scmp.ne.s32.totalorder %s95_s25, %s950_s0  ;;  %p956_p11 = scmp.lt.s32.totalorder %s950_s0, %s950_s0 }
  0x70   :  { %p957_p12 = por %p956_p11, %p955_p10 }
  0x72   :  { %p958_p13 = pnand %p957_p12, %p951_p9 }
  0x74   :  { %961 = shalt.err (!%p958_p13)
}
  0x75   :  { %s1027_s4 = smov 128   ;;  %s1028_s1 = smov 8  }
  0x76   :  { %100 = dma.hbm_to_vmem [thread:$0]  %s1266_s7, 2048, %s95_s25, [#allocation12], %s1027_s4, %s1027_s4, %s1028_s1  }
  0x77   :  { %s1029_s22 = smov [#allocation14]   ;;  %s962_s17 = scalar_lea.hbm %s1267_s8, 2048 }
  0x78   :  { %s106_s12 = sshll.u32 %s1029_s22, 4  ;;  %p963_p0 = scmp.ne.s32.totalorder %s1267_s8, %s962_s17  ;;  %s107_s12 = int_to_ptr.vmem [resolvable:$true] %s106_s12 }
  0x79   :  { %p966_p1 = scmp.lt.u32.totalorder %s962_s17, %s1267_s8 }
  0x7b   :  { %p968_p2 = pnand %p966_p1, %p963_p0 }
  0x7d   :  { %971 = shalt.err (!%p968_p2)
}
  0x7e   :  { %s972_s20 = scalar_lea.vmem %s107_s12, 2048  ;;  %p977_p4 = scmp.lt.s32.totalorder %s107_s12, %s107_s12 }
  0x7f   :  { %p973_p3 = scmp.ne.s32.totalorder %s107_s12, %s972_s20  ;;  %p978_p5 = scmp.lt.s32.totalorder %s972_s20, %s972_s20 }
  0x81   :  { %p979_p6 = por %p978_p5, %p977_p4 }
  0x83   :  { %p980_p7 = pnand %p979_p6, %p973_p3 }
  0x85   :  { %983 = shalt.err (!%p980_p7)
}
  0x86   :  { %112 = dma.hbm_to_vmem [thread:$0]  %s1267_s8, 2048, %s107_s12, [#allocation15], %s1027_s4, %s1027_s4, %s1028_s1  }
  0x87   :  { %1006 = dma.done.wait [#allocation3], 128  }
  0x88   :  { %1007 = vsyncadd [#allocation3], 4294967168 }
  0x89   :  { %1008 = dma.done.wait [#allocation6], 256  }
  0x8a   :  { %1009 = vsyncadd [#allocation6], 4294967040 }
  0x8b   :  { %1010 = dma.done.wait [#allocation9], 1280  }
  0x8c   :  { %1011 = vsyncadd [#allocation9], 4294966016 }
  0x8d   :  { %1012 = dma.done.wait [#allocation12], 2560  }
  0x8e   :  { %1013 = vsyncadd [#allocation12], 4294964736 }
  0x8f   :  { %1014 = dma.done.wait [#allocation15], 2048  }
  0x90   :  { %1015 = vsyncadd [#allocation15], 4294965248  ;;  %v1030_v0 = vmov 0.0   ;;  %vm155_vm0 = vcmask 1043456   ;;  %vm1031_vm1 = vmmov 1   ;;  %v148_v2 = vld [vmem:[#allocation10 + $0x8] sm:$0xff]  ;;  %v398_v1 = vlaneseq }
  0x91   :  { %226 = vmatprep.mubr.f32.mxu0 %v1030_v0  ;;  %307 = vmatprep.mubr.f32.mxu1 %v1030_v0  ;;  %vm1212_vm2 = vmpackc.low %vm155_vm0, %vm1031_vm1  ;;  %v150_v3 = vld [vmem:[#allocation10 + $0x18] sm:$0xf]  ;;  %v143_v6 = vld [vmem:[#allocation8 + $0x18] sm:$0xff]  ;;  %vm151_vm3 = vcmask 97280   ;;  %vm233_vm4 = vcmask 162816   ;;  %vm319_vm5 = vcmask 130048  }
  0x92   :  { %v141_v4 = vld [vmem:[#allocation8 + $0x8] sm:$0xff]  ;;  %v723_v5 = vpack.c.bf16 %v150_v3, %v148_v2  ;;  %v147_v7 = vld [vmem:[#allocation10] sm:$0xff]  ;;  %v149_v8 = vld [vmem:[#allocation10 + $0x10] sm:$0xf]  ;;  %v1032_v30 = vmov 0.0|0.0   ;;  %vm1033_vm6 = vmmov 0  }
  0x93   :  { %v729_v9 = vpack.c.bf16 %v143_v6, %v141_v4  ;;  %v726_v10 = vpack.c.bf16 %v149_v8, %v147_v7  ;;  %v140_v11 = vld [vmem:[#allocation8] sm:$0xff]  ;;  %v142_v12 = vld [vmem:[#allocation8 + $0x10] sm:$0xff]  ;;  %v145_v14 = vld [vmem:[#allocation8 + $0x28] sm:$0xf]  ;;  %v399_v2 = vshrl.u32 %v398_v1, 7  ;;  %s1034_s25 = smov [#allocation16]  }
  0x94   :  { %725 = vmatprep.subr.msk.bf16.mxu0 %vm1212_vm2, %v723_v5  ;;  %v731_v13 = vpack.c.bf16 %v142_v12, %v140_v11  ;;  %v316_v15 = vld [vmem:[#allocation11 + $0x8] sm:$0xff]  ;;  %v318_v16 = vld [vmem:[#allocation11 + $0x18] sm:$0xff]  ;;  %v146_v17 = vld [vmem:[#allocation5] sm:$0xff]  ;;  %s598_s27 = sshll.u32 %s1034_s25, 4  ;;  %s599_s27 = int_to_ptr.vmem [resolvable:$true] %s598_s27 }
  0x95   :  { %730 = vmatprep.subr.bf16.mxu1 %v729_v9  ;;  %728 = vmatpush1.bf16.msk.msra.mxu0 %vm1212_vm2, %v726_v10  ;;  %v733_v18 = vpack.c.bf16 %v318_v16, %v316_v15  ;;  %v315_v19 = vld [vmem:[#allocation11] sm:$0xff]  ;;  %v317_v20 = vld [vmem:[#allocation11 + $0x10] sm:$0xff]  ;;  %v412_v24 = vld [vmem:[#allocation13 + $0x8] sm:$0xff]  ;;  %v400_v4 = vsub.s32 0, %v399_v2  ;;  %v404_v7 = vsub.s32 1, %v399_v2  ;;  %s984_s28 = scalar_lea.vmem %s599_s27, 128  ;;  %p989_p9 = scmp.lt.s32.totalorder %s599_s27, %s599_s27 }
  0x96   :  { %732 = vmatpush1.bf16.msra.mxu1 %v731_v13  ;;  %v735_v21 = vpack.c.bf16 %v317_v20, %v315_v19  ;;  %v411_v22 = vld [vmem:[#allocation13] sm:$0xff]  ;;  %v144_v23 = vld [vmem:[#allocation8 + $0x20] sm:$0xf]  ;;  %v139_v25 = vld [vmem:[#allocation2] sm:$0xff]  ;;  %p985_p8 = scmp.ne.s32.totalorder %s599_s27, %s984_s28  ;;  %p990_p10 = scmp.lt.s32.totalorder %s984_s28, %s984_s28 }
  0x97   :  { %614 = vmatprep.subr.msk.mxu1 %vm155_vm0, %v145_v14  ;;  %734 = vmatprep.subr.bf16.mxu0 %v733_v18  ;;  %v738_v26 = vpack.c.bf16 %v412_v24, %v411_v22  ;;  %v314_v27 = vld [vmem:[#allocation7] sm:$0xff]  ;;  %v413_v28 = vld [vmem:[#allocation13 + $0x10] sm:$0xff]  ;;  %v414_v29 = vld [vmem:[#allocation13 + $0x18] sm:$0xff] }
  0x98   :  { %613 = vmatmul.mubr.msk.f32.vlgmr.msra.gmra.mrb[0].mxu0 %vm151_vm3, %v146_v17  ;;  %v741_v31 = vpack.c.bf16 %v414_v29, %v413_v28  ;;  %v415_v32 = vld [vmem:[#allocation13 + $0x20] sm:$0xff]  ;;  %v416_v33 = vld [vmem:[#allocation13 + $0x28] sm:$0xff]  ;;  %v417_v35 = vld [vmem:[#allocation13 + $0x30] sm:$0xff]  ;;  %p991_p11 = por %p990_p10, %p989_p9 }
  0x99   :  { %736 = vmatpush1.bf16.msra.mxu0 %v735_v21  ;;  %387 = vmatprep.mubr.f32.mxu0 %v1030_v0  ;;  %v744_v34 = vpack.c.bf16 %v416_v33, %v415_v32  ;;  %v418_v36 = vld [vmem:[#allocation13 + $0x38] sm:$0xff]  ;;  %v419_v38 = vld [vmem:[#allocation13 + $0x40] sm:$0xff]  ;;  %v420_v39 = vld [vmem:[#allocation13 + $0x48] sm:$0xff] }
  0x9a   :  { %615 = vmatpush1.msk.msra.mxu1 %vm155_vm0, %v144_v23  ;;  %761 = vmatprep.subr.bf16.mxu0 %v1032_v30  ;;  %v747_v37 = vpack.c.bf16 %v418_v36, %v417_v35  ;;  %v750_v40 = vpack.c.bf16 %v420_v39, %v419_v38  ;;  %v421_v41 = vld [vmem:[#allocation13 + $0x50] sm:$0xff]  ;;  %v422_v42 = vld [vmem:[#allocation13 + $0x58] sm:$0xff]  ;;  %v423_v44 = vld [vmem:[#allocation13 + $0x60] sm:$0xff]  ;;  %p992_p12 = pnand %p991_p11, %p985_p8 }
  0x9b   :  { %616 = vmatmul.mubr.msk.f32.vlgmr.msra.gmra.mrb[0].mxu1 %vm233_vm4, %v139_v25  ;;  %737 = vmatprep.subr.bf16.mxu1 %v1032_v30  ;;  %v753_v43 = vpack.c.bf16 %v422_v42, %v421_v41  ;;  %v424_v45 = vld [vmem:[#allocation13 + $0x68] sm:$0xff]  ;;  %v425_v47 = vld [vmem:[#allocation13 + $0x70] sm:$0xff]  ;;  %v426_v48 = vld [vmem:[#allocation13 + $0x78] sm:$0xff] }
  0x9c   :  { %617 = vmatmul.mubr.msk.f32.vlgmr.msra.gmra.mrb[2].mxu0 %vm319_vm5, %v314_v27  ;;  %739 = vmatpush3.bf16.msra.mxu1 %v738_v26  ;;  %v756_v46 = vpack.c.bf16 %v424_v45, %v423_v44  ;;  %v759_v49 = vpack.c.bf16 %v426_v48, %v425_v47  ;;  %v498_v50 = vld [vmem:[#allocation14] sm:$0xff]  ;;  %v499_v51 = vld [vmem:[#allocation14 + $0x8] sm:$0xff]  ;;  %v500_v52 = vld [vmem:[#allocation14 + $0x10] sm:$0xff] }
  0x9d   :  { %740 = vmatprep.subr.bf16.mxu1 %v1032_v30  ;;  %685 = vmatprep.mubr.msk.f32.mxu1 %vm1033_vm6, %v1030_v0  ;;  %v762_v53 = vpack.c.bf16 %v499_v51, %v498_v50  ;;  %v501_v54 = vld [vmem:[#allocation14 + $0x18] sm:$0xff]  ;;  %v502_v56 = vld [vmem:[#allocation14 + $0x20] sm:$0xff]  ;;  %v503_v57 = vld [vmem:[#allocation14 + $0x28] sm:$0xff] }
  0x9e   :  { %720 = vmatprep.mubr.msk.f32.mxu0 %vm1033_vm6, %v1030_v0  ;;  %v765_v55 = vpack.c.bf16 %v501_v54, %v500_v52  ;;  %v768_v58 = vpack.c.bf16 %v503_v57, %v502_v56  ;;  %v504_v59 = vld [vmem:[#allocation14 + $0x30] sm:$0xff]  ;;  %v505_v60 = vld [vmem:[#allocation14 + $0x38] sm:$0xff]  ;;  %v506_v62 = vld [vmem:[#allocation14 + $0x40] sm:$0xff] }
  0x9f   :  { %763 = vmatpush3.bf16.msra.mxu0 %v762_v53  ;;  %v771_v61 = vpack.c.bf16 %v505_v60, %v504_v59  ;;  %v507_v63 = vld [vmem:[#allocation14 + $0x48] sm:$0xff]  ;;  %v396_v6 = vld [vmem:[%s1265_s6] sm:$0x3]  ;;  %v508_v21 = vld [vmem:[#allocation14 + $0x50] sm:$0xff] }
  0xa0   :  { %742 = vmatpush3.bf16.msra.mxu1 %v741_v31  ;;  %764 = vmatprep.subr.bf16.mxu0 %v1032_v30  ;;  %v774_v0 = vpack.c.bf16 %v507_v63, %v506_v62  ;;  %v401_v12 = vrot.slane %v396_v6, %v400_v4  ;;  %v405_v15 = vrot.slane %v396_v6, %v404_v7  ;;  %v509_v22 = vld [vmem:[#allocation14 + $0x58] sm:$0xff]  ;;  %v510_v24 = vld [vmem:[#allocation14 + $0x60] sm:$0xff]  ;;  %v511_v25 = vld [vmem:[#allocation14 + $0x68] sm:$0xff] }
  0xa1   :  { %743 = vmatprep.subr.bf16.mxu1 %v1032_v30  ;;  %v777_v23 = vpack.c.bf16 %v509_v22, %v508_v21  ;;  %v780_v26 = vpack.c.bf16 %v511_v25, %v510_v24  ;;  %v512_v27 = vld [vmem:[#allocation14 + $0x70] sm:$0xff]  ;;  %v513_v28 = vld [vmem:[#allocation14 + $0x78] sm:$0xff] }
  0xa2   :  { %v783_v29 = vpack.c.bf16 %v513_v28, %v512_v27 }
  0xa3   :  { %766 = vmatpush3.bf16.msra.mxu0 %v765_v55 }
  0xa4   :  { %745 = vmatpush3.bf16.msra.mxu1 %v744_v34  ;;  %767 = vmatprep.subr.bf16.mxu0 %v1032_v30  ;;  %v618_v34 = vld [vmem:[%s1268_s9] ss:$0 sm:$0xff] }
  0xa5   :  { %746 = vmatprep.subr.bf16.mxu1 %v1032_v30 }
  0xa7   :  { %769 = vmatpush3.bf16.msra.mxu0 %v768_v58 }
  0xa8   :  { %748 = vmatpush3.bf16.msra.mxu1 %v747_v37  ;;  %770 = vmatprep.subr.bf16.mxu0 %v1032_v30 }
  0xa9   :  { %749 = vmatprep.subr.bf16.mxu1 %v1032_v30 }
  0xab   :  { %772 = vmatpush3.bf16.msra.mxu0 %v771_v61 }
  0xac   :  { %751 = vmatpush3.bf16.msra.mxu1 %v750_v40  ;;  %773 = vmatprep.subr.bf16.mxu0 %v1032_v30 }
  0xad   :  { %752 = vmatprep.subr.bf16.mxu1 %v1032_v30 }
  0xaf   :  { %775 = vmatpush3.bf16.msra.mxu0 %v774_v0 }
  0xb0   :  { %754 = vmatpush3.bf16.msra.mxu1 %v753_v43  ;;  %776 = vmatprep.subr.bf16.mxu0 %v1032_v30 }
  0xb1   :  { %755 = vmatprep.subr.bf16.mxu1 %v1032_v30 }
  0xb3   :  { %778 = vmatpush3.bf16.msra.mxu0 %v777_v23 }
  0xb4   :  { %757 = vmatpush3.bf16.msra.mxu1 %v756_v46  ;;  %779 = vmatprep.subr.bf16.mxu0 %v1032_v30 }
  0xb5   :  { %758 = vmatprep.subr.bf16.mxu1 %v1032_v30 }
  0xb7   :  { %781 = vmatpush3.bf16.msra.mxu0 %v780_v26 }
  0xb8   :  { %760 = vmatpush3.bf16.msra.mxu1 %v759_v49  ;;  %782 = vmatprep.subr.bf16.mxu0 %v1032_v30 }
  0xbb   :  { %784 = vmatpush3.bf16.msra.mxu0 %v783_v29 }
 0x16b   :  { %v228_v3 = vpop.f32.mrb[0].mxu0 }
 0x16c   :  { %v230_v5 = vpop.f32.mrb[1].mxu0 }
 0x16e   :  { %v309_v8 = vpop.f32.mrb[0].mxu1 }
 0x16f   :  { %v310_v9 = vadd.f32 %v309_v8, %v228_v3  ;;  %v311_v10 = vpop.f32.mrb[1].mxu1  ;;  %v389_v11 = vpop.f32.mrb[2].mxu0 }
 0x170   :  { %v312_v13 = vadd.f32 %v311_v10, %v230_v5  ;;  %v391_v14 = vpop.f32.mrb[3].mxu0 }
 0x171   :  { %v394_v16 = vadd.f32 %v389_v11, %v310_v9 }
 0x172   :  { %v395_v17 = vadd.f32 %v391_v14, %v312_v13 }
 0x173   :  { %v408_v18 = vadd.f32 %v401_v12, %v394_v16 }
 0x174   :  { %v409_v19 = vadd.f32 %v405_v15, %v395_v17 }
 0x176   :  { %v410_v20 = vmul.f32 %v409_v19, %v408_v18 }
 0x178   :  { %686 = vmatmul.mubr.f32.vlgmr.msra.gmra.mrb[2].mxu1 %v410_v20 }
 0x24b   :  { %v493_v31 = vpop.f32.mrb[2].mxu1 }
 0x24c   :  { %806 = vtanh.f32 %v493_v31  ;;  %v687_v32 = vpop.f32.mrb[3].mxu1 }
 0x256   :  { %v807_v33 = vpop.eup %806 }
 0x257   :  { %721 = vmatmul.mubr.f32.vlgmr.msra.gmra.mrb[4].mxu0 %v807_v33 }
 0x32a   :  { %v587_v35 = vpop.f32.mrb[4].mxu0 }
 0x32b   :  { %v588_v36 = vadd.f32 %v618_v34, %v587_v35  ;;  %v722_v37 = vpop.f32.mrb[5].mxu0 }
 0x32d   :  { %591 = vst [vmem:[#allocation16] sm:$0xff] %v588_v36 }
 0x32e   :  { %995 = shalt.err (!%p992_p12)
}
 0x32f   :  { %s996_s16 = scalar_lea.hbm %s1269_s10, 128 }
 0x330   :  { %p997_p13 = scmp.ne.s32.totalorder %s1269_s10, %s996_s16  ;;  %p1000_p0 = scmp.lt.u32.totalorder %s996_s16, %s1269_s10 }
 0x332   :  { %p1002_p1 = pnand %p1000_p0, %p997_p13 }
 0x334   :  { %1005 = shalt.err (!%p1002_p1)
}
 0x335   :  { %601 = dma.vmem_to_hbm [thread:$0]  %s599_s27, 128, %s1269_s10, [#allocation4]  }
 0x336   :  { %1016 = dma.done.wait [#allocation4], 128  }
 0x337   :  { %1017 = vsyncadd [#allocation4], 4294967168 }
 0x338   :  { %605 = vsyncpa [#allocation3], 1 }
 0x339   :  { %606 = vsyncpa [#allocation6], 1 }
 0x33a   :  { %607 = vsyncpa [#allocation9], 1 }
 0x33b   :  { %608 = vsyncpa [#allocation12], 1 }
 0x33c   :  { %609 = vsyncpa [#allocation15], 1 }
 0x33d   :  { %610 = vsyncpa [#allocation4], 1 }

</bundles_post_ra>
